<compile_context>
chip_gen: v6e
topology: v6e:2x2x1
jax: 0.10.0
libtpu: 0.0.40
codegen_flags: <defaults>
</compile_context>

<pallas_src>
import functools

import jax
import jax.numpy as jnp
from jax.experimental import pallas as pl
from jax.experimental.pallas import tpu as pltpu


# ------------------------------- kernel ----------------------------------- #
def _tnet_kernel(x_ref, w1_ref, b1_ref, w2_ref, b2_ref, w3_ref, b3_ref,
                 w4_ref, b4_ref, w5_ref, b5_ref, o_ref, acc_ref, *,
                 compute_dtype):
    """Grid = (batch, point_tile). One (F, TILE_N) tile of one batch per step."""
    t = pl.program_id(1)

    # New batch -> reset the running max over point tiles.
    @pl.when(t == 0)
    def _():
        acc_ref[...] = jnp.full_like(acc_ref, -jnp.inf)

    def dense_relu(h, w_ref, b_ref):
        # Weights carry the folded BatchNorm. The matmul runs in compute_dtype
        # with f32 accumulation on the MXU; bias add + relu stay f32 (VPU).
        y = jnp.dot(w_ref[...], h, preferred_element_type=jnp.float32)
        return jnp.maximum(y + b_ref[...], 0.0)

    # Channels on sublanes, points on lanes: activation tiles are lane-dense.
    x = x_ref[...].astype(compute_dtype)                        # (F,  TILE_N)
    h = dense_relu(x, w1_ref, b1_ref)                           # (U,  TILE_N) f32
    h = dense_relu(h.astype(compute_dtype), w2_ref, b2_ref)     # (2U, TILE_N) f32
    h = dense_relu(h.astype(compute_dtype), w3_ref, b3_ref)     # (4U, TILE_N) f32

    # torch.max(x, dim=2): running max over point tiles (lane-axis reduce).
    acc_ref[...] = jnp.maximum(acc_ref[...],
                               jnp.max(h, axis=1, keepdims=True))

    # fc1 / fc2 tail runs once per batch, on the last point tile only.
    @pl.when(t == pl.num_programs(1) - 1)
    def _():
        g = acc_ref[...].astype(compute_dtype)                  # (4U, 1)
        y = dense_relu(g, w4_ref, b4_ref)                       # (2U, 1) f32
        z = dense_relu(y.astype(compute_dtype), w5_ref, b5_ref)  # (U, 1) f32
        o_ref[...] = z.astype(o_ref.dtype)


# ------------------------- host-side fusion helpers ----------------------- #
def _fold_bn(w, b, bn):
    """Fold an eval-mode BatchNorm1d that follows a linear / conv1x1 layer."""
    s = bn["gamma"] / jnp.sqrt(bn["var"] + bn["eps"])
    return w * s[:, None], (b - bn["mean"]) * s + bn["beta"]


def _pick_tile_n(n):
    """Lane-dense point tile: big enough to amortize per-step overhead, small
    enough to keep double-buffering alive within v7x's 64 MiB VMEM."""
    for t in (512, 256, 128):
        if n % t == 0:
            return t
    # TODO(synk): ragged N (not a multiple of 128) currently falls back to one
    #             full-N tile per batch; add a lane mask for huge ragged N.
    return n


def tnet_forward(x, params, *, compute_dtype=jnp.bfloat16):
    """x: (B, F, N) float32. params: PyTorch-layout weights + BN running stats."""
    B, F, N = x.shape
    U = params["w1"].shape[0]

    # ---- host-side fusion & layout plumbing (one-time, tiny) -------------- #
    # input_batch_norm (eval) -> per-feature affine folded into conv1.
    bn0 = params["bn0"]
    a0 = bn0["gamma"] / jnp.sqrt(bn0["var"] + bn0["eps"])
    c0 = bn0["beta"] - bn0["mean"] * a0
    w1 = params["w1"] * a0[None, :]
    b1 = params["b1"] + params["w1"] @ c0
    # Fold bn1..bn5 into their conv / linear layers.
    w1, b1 = _fold_bn(w1, b1, params["bn1"])
    w2, b2 = _fold_bn(params["w2"], params["b2"], params["bn2"])
    w3, b3 = _fold_bn(params["w3"], params["b3"], params["bn3"])
    w4, b4 = _fold_bn(params["w4"], params["b4"], params["bn4"])
    w5, b5 = _fold_bn(params["w5"], params["b5"], params["bn5"])

    # Weights stay in (out, in) layout — they are the LHS of every matmul, so
    # no transposes anywhere — cast to the MXU-native compute dtype.
    # Biases stay f32 as (out, 1) columns (added post-matmul in f32).
    ws = [w.astype(compute_dtype) for w in (w1, w2, w3, w4, w5)]
    bs = [b.reshape(-1, 1).astype(jnp.float32) for b in (b1, b2, b3, b4, b5)]

    tile_n = _pick_tile_n(N)
    grid = (B, N // tile_n)

    def const_spec(shape):
        # Constant index map: parameter is DMA'd once and stays VMEM-resident.
        return pl.BlockSpec(shape, lambda b, t, _n=len(shape): (0,) * _n)

    # x consumed directly as (B, F, N): no wrapper transpose / extra HBM pass.
    # If the producer emits bf16 x, it is accepted as-is (cast is in-kernel).
    in_specs = [pl.BlockSpec((None, F, tile_n), lambda b, t: (b, 0, t))]
    flat_args = [x]
    for w, bias in zip(ws, bs):
        in_specs += [const_spec(w.shape), const_spec(bias.shape)]
        flat_args += [w, bias]

    kernel = functools.partial(_tnet_kernel, compute_dtype=compute_dtype)

    out = pl.pallas_call(
        kernel,
        # (B, U, 1): the tail is computed column-major (out-features on
        # sublanes); the trailing unit dim is dropped by a free host reshape.
        out_shape=jax.ShapeDtypeStruct((B, U, 1), jnp.float32),
        grid_spec=pltpu.PrefetchScalarGridSpec(
            num_scalar_prefetch=0,
            grid=grid,
            in_specs=in_specs,
            out_specs=pl.BlockSpec((None, U, 1), lambda b, t: (b, 0, 0)),
            scratch_shapes=[pltpu.VMEM((4 * U, 1), jnp.float32)],  # running max
        ),
        compiler_params=pltpu.CompilerParams(
            # batch parallel (2 TCs on v7x), point-tile carries the accumulator.
            dimension_semantics=("parallel", "arbitrary"),
            # Above v5e's 16 MiB default, below v7x's 64 MiB physical VMEM.
            vmem_limit_bytes=48 * 1024 * 1024,
        ),
    )(*flat_args)

    return out.reshape(B, U)   # metadata-only reshape (drop trailing unit dim)


# ------------------------------- reference -------------------------------- #
def _bn_ref(x, bn, axis):
    shape = [1] * x.ndim
    shape[axis] = -1
    r = lambda v: v.reshape(shape)
    return (x - r(bn["mean"])) / jnp.sqrt(r(bn["var"]) + bn["eps"]) * r(bn["gamma"]) + r(bn["beta"])


def _reference(x, params):
    """Pure-JAX mirror of the PyTorch eval forward (un-fused BN, f32)."""
    pH = jax.lax.Precision.HIGHEST
    relu = jax.nn.relu
    h = _bn_ref(x, params["bn0"], axis=1)
    h = jnp.einsum("uf,bfn->bun", params["w1"], h, precision=pH) + params["b1"][None, :, None]
    h = relu(_bn_ref(h, params["bn1"], axis=1))
    h = jnp.einsum("vu,bun->bvn", params["w2"], h, precision=pH) + params["b2"][None, :, None]
    h = relu(_bn_ref(h, params["bn2"], axis=1))
    h = jnp.einsum("wv,bvn->bwn", params["w3"], h, precision=pH) + params["b3"][None, :, None]
    h = relu(_bn_ref(h, params["bn3"], axis=1))
    g = jnp.max(h, axis=2)
    g = jnp.dot(g, params["w4"].T, precision=pH) + params["b4"]
    g = relu(_bn_ref(g, params["bn4"], axis=1))
    g = jnp.dot(g, params["w5"].T, precision=pH) + params["b5"]
    g = relu(_bn_ref(g, params["bn5"], axis=1))
    return g


if __name__ == "__main__":
    # Small config: numberofVars=3, numberofYs=1 -> F=4; numberofPoints=256
    # (so the tiled grid + running-max path is actually exercised: 2 point
    # tiles of 128); embeddingSize U=32 (4 -> 32 -> 64 -> 128 -> max -> 64 -> 32).
    B, F, N, U = 2, 4, 256, 32

    key = jax.random.PRNGKey(0)
    keys = iter(jax.random.split(key, 40))

    def make_bn(c):
        return {
            "gamma": 1.0 + 0.1 * jax.random.normal(next(keys), (c,), jnp.float32),
            "beta": 0.1 * jax.random.normal(next(keys), (c,), jnp.float32),
            "mean": 0.1 * jax.random.normal(next(keys), (c,), jnp.float32),
            "var": jnp.abs(jax.random.normal(next(keys), (c,), jnp.float32)) + 0.5,
            "eps": 1e-5,
        }

    def make_lin(out_c, in_c):
        w = 0.1 * jax.random.normal(next(keys), (out_c, in_c), jnp.float32)
        b = 0.1 * jax.random.normal(next(keys), (out_c,), jnp.float32)
        return w, b

    params = {}
    params["bn0"] = make_bn(F)
    params["w1"], params["b1"] = make_lin(U, F)
    params["bn1"] = make_bn(U)
    params["w2"], params["b2"] = make_lin(2 * U, U)
    params["bn2"] = make_bn(2 * U)
    params["w3"], params["b3"] = make_lin(4 * U, 2 * U)
    params["bn3"] = make_bn(4 * U)
    params["w4"], params["b4"] = make_lin(2 * U, 4 * U)   # fc1
    params["bn4"] = make_bn(2 * U)
    params["w5"], params["b5"] = make_lin(U, 2 * U)       # fc2
    params["bn5"] = make_bn(U)

    x = jax.random.normal(next(keys), (B, F, N), jnp.float32)

    # Performance config: bf16 matmul operands, f32 accumulation.
    out_bf16 = jax.block_until_ready(tnet_forward(x, params))
    # Numerics check config: same kernel, f32 operands.
    out_f32 = jax.block_until_ready(
        tnet_forward(x, params, compute_dtype=jnp.float32))

    ref = _reference(x, params)
    assert out_bf16.shape == (B, U), out_bf16.shape
    assert out_f32.shape == (B, U), out_f32.shape

    err_f32 = float(jnp.max(jnp.abs(out_f32 - ref)))
    err_bf16 = float(jnp.max(jnp.abs(out_bf16 - ref)))
    assert jnp.allclose(out_f32, ref, atol=1e-4, rtol=1e-4), (
        f"f32 kernel mismatch vs JAX reference: max abs err {err_f32}")
    assert jnp.allclose(out_bf16, ref, atol=5e-2, rtol=5e-2), (
        f"bf16 kernel mismatch vs JAX reference: max abs err {err_bf16}")

    print("KERNEL_OK")
</pallas_src>

<mosaic_0001>
module attributes {stable_mosaic.version = 11 : i64} {
  func.func @_tnet_kernel(%arg0: i32, %arg1: i32, %arg2: memref<1x4x256xf32, #tpu.memory_space<vmem>>, %arg3: memref<32x4xbf16, #tpu.memory_space<vmem>>, %arg4: memref<32x1xf32, #tpu.memory_space<vmem>>, %arg5: memref<64x32xbf16, #tpu.memory_space<vmem>>, %arg6: memref<64x1xf32, #tpu.memory_space<vmem>>, %arg7: memref<128x64xbf16, #tpu.memory_space<vmem>>, %arg8: memref<128x1xf32, #tpu.memory_space<vmem>>, %arg9: memref<64x128xbf16, #tpu.memory_space<vmem>>, %arg10: memref<64x1xf32, #tpu.memory_space<vmem>>, %arg11: memref<32x64xbf16, #tpu.memory_space<vmem>>, %arg12: memref<32x1xf32, #tpu.memory_space<vmem>>, %arg13: memref<1x32x1xf32, #tpu.memory_space<vmem>>, %arg14: memref<128x1xf32, #tpu.memory_space<vmem>>) attributes {dimension_semantics = [#tpu.dimension_semantics<parallel>, #tpu.dimension_semantics<arbitrary>], iteration_bounds = array<i64: 2, 1>, scalar_prefetch = 0 : i64, scratch_operands = 1 : i64, tpu.core_type = #tpu.core_type<tc>, window_params = [{transform_indices = @transform_0, window_bounds = array<i64: 1, 4, 256>}, {pipeline_mode = #tpu.pipeline_mode<synchronous>, transform_indices = @transform_1, window_bounds = array<i64: 32, 4>}, {pipeline_mode = #tpu.pipeline_mode<synchronous>, transform_indices = @transform_2, window_bounds = array<i64: 32, 1>}, {pipeline_mode = #tpu.pipeline_mode<synchronous>, transform_indices = @transform_3, window_bounds = array<i64: 64, 32>}, {pipeline_mode = #tpu.pipeline_mode<synchronous>, transform_indices = @transform_4, window_bounds = array<i64: 64, 1>}, {pipeline_mode = #tpu.pipeline_mode<synchronous>, transform_indices = @transform_5, window_bounds = array<i64: 128, 64>}, {pipeline_mode = #tpu.pipeline_mode<synchronous>, transform_indices = @transform_6, window_bounds = array<i64: 128, 1>}, {pipeline_mode = #tpu.pipeline_mode<synchronous>, transform_indices = @transform_7, window_bounds = array<i64: 64, 128>}, {pipeline_mode = #tpu.pipeline_mode<synchronous>, transform_indices = @transform_8, window_bounds = array<i64: 64, 1>}, {pipeline_mode = #tpu.pipeline_mode<synchronous>, transform_indices = @transform_9, window_bounds = array<i64: 32, 64>}, {pipeline_mode = #tpu.pipeline_mode<synchronous>, transform_indices = @transform_10, window_bounds = array<i64: 32, 1>}, {transform_indices = @transform_11, window_bounds = array<i64: 1, 32, 1>}]} {
    %c0_i32 = arith.constant 0 : i32
    %0 = arith.cmpi eq, %arg1, %c0_i32 : i32
    %1 = arith.extui %0 : i1 to i32
    %c0_i32_0 = arith.constant 0 : i32
    %2 = arith.cmpi ne, %1, %c0_i32_0 : i32
    scf.if %2 {
      %cst_27 = arith.constant 0xFF800000 : f32
      %37 = vector.broadcast %cst_27 : f32 to vector<128x1xf32>
      %c0_28 = arith.constant 0 : index
      %c0_29 = arith.constant 0 : index
      %38 = vector.load %arg14[%c0_28, %c0_29] : memref<128x1xf32, #tpu.memory_space<vmem>>, vector<128x1xf32>
      tpu.vector_store %arg14[%c0_28, %c0_29], %37 {strides = array<i32>} : memref<128x1xf32, #tpu.memory_space<vmem>>, vector<128x1xf32>,
    } else {
    }
    %c0 = arith.constant 0 : index
    %c0_1 = arith.constant 0 : index
    %c0_2 = arith.constant 0 : index
    %3 = vector.load %arg2[%c0, %c0_1, %c0_2] : memref<1x4x256xf32, #tpu.memory_space<vmem>>, vector<1x4x256xf32>
    %4 = vector.shape_cast %3 : vector<1x4x256xf32> to vector<4x256xf32>
    %5 = arith.truncf %4 : vector<4x256xf32> to vector<4x256xbf16>
    %c0_3 = arith.constant 0 : index
    %c0_4 = arith.constant 0 : index
    %6 = vector.load %arg3[%c0_3, %c0_4] : memref<32x4xbf16, #tpu.memory_space<vmem>>, vector<32x4xbf16>
    %cst = arith.constant dense<0.000000e+00> : vector<32x256xf32>
    %7 = tpu.matmul %6, %5, %cst {dimension_numbers = #tpu.dot_dimension_numbers<[1], [0], [0], [1], [0, 0, 1, 1], [], []>} : vector<32x4xbf16>, vector<4x256xbf16>, vector<32x256xf32> -> vector<32x256xf32>
    %c0_5 = arith.constant 0 : index
    %c0_6 = arith.constant 0 : index
    %8 = vector.load %arg4[%c0_5, %c0_6] : memref<32x1xf32, #tpu.memory_space<vmem>>, vector<32x1xf32>
    %9 = vector.broadcast %8 : vector<32x1xf32> to vector<32x256xf32>
    %10 = arith.addf %7, %9 : vector<32x256xf32>
    %cst_7 = arith.constant 0.000000e+00 : f32
    %11 = vector.broadcast %cst_7 : f32 to vector<32x256xf32>
    %12 = arith.maximumf %10, %11 : vector<32x256xf32>
    %13 = arith.truncf %12 : vector<32x256xf32> to vector<32x256xbf16>
    %c0_8 = arith.constant 0 : index
    %c0_9 = arith.constant 0 : index
    %14 = vector.load %arg5[%c0_8, %c0_9] : memref<64x32xbf16, #tpu.memory_space<vmem>>, vector<64x32xbf16>
    %cst_10 = arith.constant dense<0.000000e+00> : vector<64x256xf32>
    %15 = tpu.matmul %14, %13, %cst_10 {dimension_numbers = #tpu.dot_dimension_numbers<[1], [0], [0], [1], [0, 0, 1, 1], [], []>} : vector<64x32xbf16>, vector<32x256xbf16>, vector<64x256xf32> -> vector<64x256xf32>
    %c0_11 = arith.constant 0 : index
    %c0_12 = arith.constant 0 : index
    %16 = vector.load %arg6[%c0_11, %c0_12] : memref<64x1xf32, #tpu.memory_space<vmem>>, vector<64x1xf32>
    %17 = vector.broadcast %16 : vector<64x1xf32> to vector<64x256xf32>
    %18 = arith.addf %15, %17 : vector<64x256xf32>
    %cst_13 = arith.constant 0.000000e+00 : f32
    %19 = vector.broadcast %cst_13 : f32 to vector<64x256xf32>
    %20 = arith.maximumf %18, %19 : vector<64x256xf32>
    %21 = arith.truncf %20 : vector<64x256xf32> to vector<64x256xbf16>
    %c0_14 = arith.constant 0 : index
    %c0_15 = arith.constant 0 : index
    %22 = vector.load %arg7[%c0_14, %c0_15] : memref<128x64xbf16, #tpu.memory_space<vmem>>, vector<128x64xbf16>
    %cst_16 = arith.constant dense<0.000000e+00> : vector<128x256xf32>
    %23 = tpu.matmul %22, %21, %cst_16 {dimension_numbers = #tpu.dot_dimension_numbers<[1], [0], [0], [1], [0, 0, 1, 1], [], []>} : vector<128x64xbf16>, vector<64x256xbf16>, vector<128x256xf32> -> vector<128x256xf32>
    %c0_17 = arith.constant 0 : index
    %c0_18 = arith.constant 0 : index
    %24 = vector.load %arg8[%c0_17, %c0_18] : memref<128x1xf32, #tpu.memory_space<vmem>>, vector<128x1xf32>
    %25 = vector.broadcast %24 : vector<128x1xf32> to vector<128x256xf32>
    %26 = arith.addf %23, %25 : vector<128x256xf32>
    %cst_19 = arith.constant 0.000000e+00 : f32
    %27 = vector.broadcast %cst_19 : f32 to vector<128x256xf32>
    %28 = arith.maximumf %26, %27 : vector<128x256xf32>
    %c0_20 = arith.constant 0 : index
    %c0_21 = arith.constant 0 : index
    %29 = vector.load %arg14[%c0_20, %c0_21] : memref<128x1xf32, #tpu.memory_space<vmem>>, vector<128x1xf32>
    %cst_22 = arith.constant dense<0xFF800000> : vector<128xf32>
    %30 = vector.multi_reduction <maximumf>, %28, %cst_22 [1] : vector<128x256xf32> to vector<128xf32>
    %31 = vector.shape_cast %30 : vector<128xf32> to vector<128x1xf32>
    %32 = arith.maximumf %29, %31 : vector<128x1xf32>
    %c0_23 = arith.constant 0 : index
    %c0_24 = arith.constant 0 : index
    %33 = vector.load %arg14[%c0_23, %c0_24] : memref<128x1xf32, #tpu.memory_space<vmem>>, vector<128x1xf32>
    tpu.vector_store %arg14[%c0_23, %c0_24], %32 {strides = array<i32>} : memref<128x1xf32, #tpu.memory_space<vmem>>, vector<128x1xf32>,
    %c0_i32_25 = arith.constant 0 : i32
    %34 = arith.cmpi eq, %arg1, %c0_i32_25 : i32
    %35 = arith.extui %34 : i1 to i32
    %c0_i32_26 = arith.constant 0 : i32
    %36 = arith.cmpi ne, %35, %c0_i32_26 : i32
    scf.if %36 {
      %c0_27 = arith.constant 0 : index
      %c0_28 = arith.constant 0 : index
      %37 = vector.load %arg14[%c0_27, %c0_28] : memref<128x1xf32, #tpu.memory_space<vmem>>, vector<128x1xf32>
      %38 = arith.truncf %37 : vector<128x1xf32> to vector<128x1xbf16>
      %c0_29 = arith.constant 0 : index
      %c0_30 = arith.constant 0 : index
      %39 = vector.load %arg9[%c0_29, %c0_30] : memref<64x128xbf16, #tpu.memory_space<vmem>>, vector<64x128xbf16>
      %cst_31 = arith.constant dense<0.000000e+00> : vector<64x1xf32>
      %40 = tpu.matmul %39, %38, %cst_31 {dimension_numbers = #tpu.dot_dimension_numbers<[1], [0], [0], [1], [0, 0, 1, 1], [], []>} : vector<64x128xbf16>, vector<128x1xbf16>, vector<64x1xf32> -> vector<64x1xf32>
      %c0_32 = arith.constant 0 : index
      %c0_33 = arith.constant 0 : index
      %41 = vector.load %arg10[%c0_32, %c0_33] : memref<64x1xf32, #tpu.memory_space<vmem>>, vector<64x1xf32>
      %42 = arith.addf %40, %41 : vector<64x1xf32>
      %cst_34 = arith.constant 0.000000e+00 : f32
      %43 = vector.broadcast %cst_34 : f32 to vector<64x1xf32>
      %44 = arith.maximumf %42, %43 : vector<64x1xf32>
      %45 = arith.truncf %44 : vector<64x1xf32> to vector<64x1xbf16>
      %c0_35 = arith.constant 0 : index
      %c0_36 = arith.constant 0 : index
      %46 = vector.load %arg11[%c0_35, %c0_36] : memref<32x64xbf16, #tpu.memory_space<vmem>>, vector<32x64xbf16>
      %cst_37 = arith.constant dense<0.000000e+00> : vector<32x1xf32>
      %47 = tpu.matmul %46, %45, %cst_37 {dimension_numbers = #tpu.dot_dimension_numbers<[1], [0], [0], [1], [0, 0, 1, 1], [], []>} : vector<32x64xbf16>, vector<64x1xbf16>, vector<32x1xf32> -> vector<32x1xf32>
      %c0_38 = arith.constant 0 : index
      %c0_39 = arith.constant 0 : index
      %48 = vector.load %arg12[%c0_38, %c0_39] : memref<32x1xf32, #tpu.memory_space<vmem>>, vector<32x1xf32>
      %49 = arith.addf %47, %48 : vector<32x1xf32>
      %cst_40 = arith.constant 0.000000e+00 : f32
      %50 = vector.broadcast %cst_40 : f32 to vector<32x1xf32>
      %51 = arith.maximumf %49, %50 : vector<32x1xf32>
      %c0_41 = arith.constant 0 : index
      %c0_42 = arith.constant 0 : index
      %c0_43 = arith.constant 0 : index
      %52 = vector.load %arg13[%c0_41, %c0_42, %c0_43] : memref<1x32x1xf32, #tpu.memory_space<vmem>>, vector<1x32x1xf32>
      %53 = vector.shape_cast %52 : vector<1x32x1xf32> to vector<32x1xf32>
      %54 = vector.shape_cast %51 : vector<32x1xf32> to vector<1x32x1xf32>
      tpu.vector_store %arg13[%c0_41, %c0_42, %c0_43], %54 {strides = array<i32>} : memref<1x32x1xf32, #tpu.memory_space<vmem>>, vector<1x32x1xf32>,
    } else {
    }
    return
  }
  func.func @transform_0(%arg0: i32, %arg1: i32) -> (i32, i32, i32) {
    %c0_i32 = arith.constant 0 : i32
    %c0_i32_0 = arith.constant 0 : i32
    return %arg0, %c0_i32, %arg1 : i32, i32, i32
  }
  func.func @transform_1(%arg0: i32, %arg1: i32) -> (i32, i32) {
    %c0_i32 = arith.constant 0 : i32
    %c0_i32_0 = arith.constant 0 : i32
    %c0_i32_1 = arith.constant 0 : i32
    return %c0_i32, %c0_i32_0 : i32, i32
  }
  func.func @transform_2(%arg0: i32, %arg1: i32) -> (i32, i32) {
    %c0_i32 = arith.constant 0 : i32
    %c0_i32_0 = arith.constant 0 : i32
    %c0_i32_1 = arith.constant 0 : i32
    return %c0_i32, %c0_i32_0 : i32, i32
  }
  func.func @transform_3(%arg0: i32, %arg1: i32) -> (i32, i32) {
    %c0_i32 = arith.constant 0 : i32
    %c0_i32_0 = arith.constant 0 : i32
    %c0_i32_1 = arith.constant 0 : i32
    return %c0_i32, %c0_i32_0 : i32, i32
  }
  func.func @transform_4(%arg0: i32, %arg1: i32) -> (i32, i32) {
    %c0_i32 = arith.constant 0 : i32
    %c0_i32_0 = arith.constant 0 : i32
    %c0_i32_1 = arith.constant 0 : i32
    return %c0_i32, %c0_i32_0 : i32, i32
  }
  func.func @transform_5(%arg0: i32, %arg1: i32) -> (i32, i32) {
    %c0_i32 = arith.constant 0 : i32
    %c0_i32_0 = arith.constant 0 : i32
    %c0_i32_1 = arith.constant 0 : i32
    return %c0_i32, %c0_i32_0 : i32, i32
  }
  func.func @transform_6(%arg0: i32, %arg1: i32) -> (i32, i32) {
    %c0_i32 = arith.constant 0 : i32
    %c0_i32_0 = arith.constant 0 : i32
    %c0_i32_1 = arith.constant 0 : i32
    return %c0_i32, %c0_i32_0 : i32, i32
  }
  func.func @transform_7(%arg0: i32, %arg1: i32) -> (i32, i32) {
    %c0_i32 = arith.constant 0 : i32
    %c0_i32_0 = arith.constant 0 : i32
    %c0_i32_1 = arith.constant 0 : i32
    return %c0_i32, %c0_i32_0 : i32, i32
  }
  func.func @transform_8(%arg0: i32, %arg1: i32) -> (i32, i32) {
    %c0_i32 = arith.constant 0 : i32
    %c0_i32_0 = arith.constant 0 : i32
    %c0_i32_1 = arith.constant 0 : i32
    return %c0_i32, %c0_i32_0 : i32, i32
  }
  func.func @transform_9(%arg0: i32, %arg1: i32) -> (i32, i32) {
    %c0_i32 = arith.constant 0 : i32
    %c0_i32_0 = arith.constant 0 : i32
    %c0_i32_1 = arith.constant 0 : i32
    return %c0_i32, %c0_i32_0 : i32, i32
  }
  func.func @transform_10(%arg0: i32, %arg1: i32) -> (i32, i32) {
    %c0_i32 = arith.constant 0 : i32
    %c0_i32_0 = arith.constant 0 : i32
    %c0_i32_1 = arith.constant 0 : i32
    return %c0_i32, %c0_i32_0 : i32, i32
  }
  func.func @transform_11(%arg0: i32, %arg1: i32) -> (i32, i32, i32) {
    %c0_i32 = arith.constant 0 : i32
    %c0_i32_0 = arith.constant 0 : i32
    %c0_i32_1 = arith.constant 0 : i32
    return %arg0, %c0_i32, %c0_i32_0 : i32, i32, i32
  }
}

</mosaic_0001>

<bundles_post_ra>
// kernel: tpu_custom_call.1
= control target key start
LH: loop header
LB: loop body
LE: loop exit
PB: predicated region body
PF: predicated region fallthrough
CT: control target
= control target key end

     0   :  { %s1698_s17 = smov 0   ;;  %s1700_s18 = smov 0   ;;  %s2054_s0 = inlined_call_operand.vmem [shape: f32[2,4,256], index: 0, kind: input, shape index: {}]   ;;  %s2055_s1 = inlined_call_operand.vmem [shape: bf16[32,4], index: 1, kind: input, shape index: {}]   ;;  %s2056_s2 = inlined_call_operand.vmem [shape: f32[32,1], index: 2, kind: input, shape index: {}]   ;;  %s2057_s3 = inlined_call_operand.vmem [shape: bf16[64,32], index: 3, kind: input, shape index: {}]   ;;  %s2058_s4 = inlined_call_operand.vmem [shape: f32[64,1], index: 4, kind: input, shape index: {}]   ;;  %s2059_s5 = inlined_call_operand.vmem [shape: bf16[128,64], index: 5, kind: input, shape index: {}]   ;;  %s2060_s6 = inlined_call_operand.vmem [shape: f32[128,1], index: 6, kind: input, shape index: {}]   ;;  %s2061_s7 = inlined_call_operand.vmem [shape: bf16[64,128], index: 7, kind: input, shape index: {}]   ;;  %s2062_s8 = inlined_call_operand.vmem [shape: f32[64,1], index: 8, kind: input, shape index: {}]   ;;  %s2063_s9 = inlined_call_operand.vmem [shape: bf16[32,64], index: 9, kind: input, shape index: {}]   ;;  %s2064_s10 = inlined_call_operand.vmem [shape: f32[32,1], index: 10, kind: input, shape index: {}]   ;;  %s2065_s11 = inlined_call_operand.vmem [shape: f32[2,32,1], index: 11, kind: output, shape index: {}]  }
   0x1   :  { %s1702_s19 = smov 0  }
   0x2 LB: > { %s33_s20 = sadd.s32 1, %s1630_s18  ;;  %p1463_p0 = scmp.ge.s32.totalorder %s1634_s19, 1  ;;  %s1634_s19 = sphi %s1702_s19, %s21_s19   ;;  %s1630_s18 = sphi %s1700_s18, %s2067_s18   ;;  %s1626_s17 = sphi %s1698_s17, %s2066_s17  }
   0x3   : > { %p35_p1 = scmp.ge.s32.totalorder %s33_s20, 2  ;;  %p356_p2 = scmp.lt.s32.totalorder %s1634_s19, 3 }
   0x5   : > { %s2069_s20 = smov (%p35_p1, %s33_s20), 0  ;;  %p357_p3 = pnand %p1463_p0, %p356_p2 }
   0x6   : > { %p401_p4 = scmp.lt.s32.totalorder (!%p357_p3), %s1626_s17, 1 }
   0x7   : > { %360 = sbr.rel (%p357_p3) target bundleno = 1364 (0x554), region = 64 }
   0xc   : > { %v1636_v0 = vmov 0   ;;  %s2071_s17 = smov (!%p401_p4, %s1626_s17), 1  ;;  %v449_v1 = vld [vmem:[%s2056_s2 + $0x10] sm:$0xff]  ;;  %v447_v2 = vld [vmem:[%s2056_s2] sm:$0xff]  ;;  %v450_v3 = vld [vmem:[%s2056_s2 + $0x18] sm:$0xff]  ;;  %vm488_vm0 = vcmask 1041408  }
   0xd   : > { %527 = vmatprep.mubr.bf16.mxu1 %v1636_v0  ;;  %1589 = vset.pattern.permute.xlu0 %v1636_v0  ;;  %s1507_s25 = sshll.u32 %s2071_s17, 3  ;;  %v448_v4 = vld [vmem:[%s2056_s2 + $0x8] sm:$0xff]  ;;  %v574_v8 = vld [vmem:[%s2058_s4 + $0x30] sm:$0xff]  ;;  %v575_v11 = vld [vmem:[%s2058_s4 + $0x38] sm:$0xff]  ;;  %vm481_vm1 = vcmask 31744   ;;  %vm636_vm2 = vcmask 261120  }
   0xe   : > { %1590 = vset.pattern.permute.xlu1 %v1636_v0  ;;  %955 = vmatprep.mubr.bf16.mxu0 %v1636_v0  ;;  %s408_s30 = scalar_lea.vmem %s2054_s0, %s1507_s25  ;;  %v1592_v12 = vld [vmem:[%s2055_s1] sm:$0xff]   ;;  %v573_v14 = vld [vmem:[%s2058_s4 + $0x28] sm:$0xff]  ;;  %v570_v15 = vld [vmem:[%s2058_s4 + $0x10] sm:$0xff]  ;;  %vm898_vm3 = vcmask 523264   ;;  %vm420_vm4 = vcmask 7168   ;;  %s1508_s15 = sshll.u32 %s2071_s17, 5 }
   0xf   : > { %463 = vperm.xlu0 %1589, %v449_v1   ;;  %453 = vperm.xlu1 %1590, %v447_v2   ;;  %v437_v5 = vld [vmem:[%s408_s30] sm:$0xff]  ;;  %v571_v16 = vld [vmem:[%s2058_s4 + $0x18] sm:$0xff]  ;;  %v1593_v17 = vld [vmem:[%s2055_s1 + $0x8] sm:$0xff]   ;;  %s414_s24 = scalar_lea.vmem %s2065_s11, %s1508_s15 }
  0x10   : > { %v439_v6 = vcombine.high %v437_v5, %v437_v5  ;;  %v441_v7 = vpack.c.bf16 %v437_v5, %v437_v5  ;;  %v572_v13 = vld [vmem:[%s2058_s4 + $0x20] sm:$0xff]  ;;  %v569_v19 = vld [vmem:[%s2058_s4 + $0x8] sm:$0xff]  ;;  %v776_v20 = vld [vmem:[%s2060_s6 + $0x70] sm:$0xff] }
  0x11   : > { %v568_v18 = vld [vmem:[%s2058_s4] sm:$0xff]  ;;  %v777_v21 = vld [vmem:[%s2060_s6 + $0x78] sm:$0xff]  ;;  %v775_v23 = vld [vmem:[%s2060_s6 + $0x68] sm:$0xff] }
  0x12   : > { %v442_v9 = vpack.c.bf16 %v439_v6, %v439_v6  ;;  %v490_v10 = vsel %vm488_vm0, %v441_v7, 0  ;;  %v774_v22 = vld [vmem:[%s2060_s6 + $0x60] sm:$0xff]  ;;  %v772_v24 = vld [vmem:[%s2060_s6 + $0x50] sm:$0xff]  ;;  %v773_v25 = vld [vmem:[%s2060_s6 + $0x58] sm:$0xff] }
  0x13   : > { %468 = vperm.xlu0 %1589, %v450_v3   ;;  %458 = vperm.xlu1 %1590, %v448_v4   ;;  %v770_v26 = vld [vmem:[%s2060_s6 + $0x40] sm:$0xff]  ;;  %v771_v27 = vld [vmem:[%s2060_s6 + $0x48] sm:$0xff]  ;;  %v768_v28 = vld [vmem:[%s2060_s6 + $0x30] sm:$0xff] }
  0x14   : > { %1470 = vmatprep.subr.msk.bf16.mxu1 %vm488_vm0, %v442_v9  ;;  %v769_v29 = vld [vmem:[%s2060_s6 + $0x38] sm:$0xff]  ;;  %v766_v30 = vld [vmem:[%s2060_s6 + $0x20] sm:$0xff]  ;;  %v767_v31 = vld [vmem:[%s2060_s6 + $0x28] sm:$0xff] }
  0x15   : > { %510 = vmatpush1.bf16.msra.mxu1 %v490_v10  ;;  %v764_v32 = vld [vmem:[%s2060_s6 + $0x10] sm:$0xff]  ;;  %v765_v33 = vld [vmem:[%s2060_s6 + $0x18] sm:$0xff]  ;;  %v762_v34 = vld [vmem:[%s2060_s6] sm:$0xff] }
  0x16   : > { %v763_v35 = vld [vmem:[%s2060_s6 + $0x8] sm:$0xff]  ;;  %v1594_v5 = vld [vmem:[%s2057_s3] sm:$0xff]   ;;  %v1596_v7 = vld [vmem:[%s2057_s3 + $0x10] sm:$0xff]  }
  0x17   : > { %608 = vperm.xlu0 %1589, %v574_v8   ;;  %613 = vperm.xlu1 %1590, %v575_v11   ;;  %v1595_v6 = vld [vmem:[%s2057_s3 + $0x8] sm:$0xff]   ;;  %v1597_v8 = vld [vmem:[%s2057_s3 + $0x18] sm:$0xff]  }
  0x18   : > { %1471 = vmatmul.mubr.msk.bf16.vlgmr.msra.gmra.mxu1 %vm481_vm1, %v1592_v12 }
  0x19   : > { %537 = vmatprep.mubr.bf16.mxu1 %v1636_v0 }
  0x1b   : > { %598 = vperm.xlu0 %1589, %v572_v13   ;;  %603 = vperm.xlu1 %1590, %v573_v14  }
  0x1f   : > { %588 = vperm.xlu0 %1589, %v570_v15   ;;  %593 = vperm.xlu1 %1590, %v571_v16  }
  0x20   : > { %1472 = vmatmul.mubr.msk.bf16.gmra.mxu1 %vm481_vm1, %v1593_v17 }
  0x21   : > { %681 = vmatprep.mubr.bf16.mxu1 %v1636_v0 }
  0x23   : > { %578 = vperm.xlu0 %1589, %v568_v18   ;;  %583 = vperm.xlu1 %1590, %v569_v19  }
  0x27   : > { %850 = vperm.xlu0 %1589, %v776_v20   ;;  %855 = vperm.xlu1 %1590, %v777_v21  }
  0x2b   : > { %840 = vperm.xlu0 %1589, %v774_v22   ;;  %845 = vperm.xlu1 %1590, %v775_v23  }
  0x2f   : > { %830 = vperm.xlu0 %1589, %v772_v24   ;;  %835 = vperm.xlu1 %1590, %v773_v25  }
  0x33   : > { %820 = vperm.xlu0 %1589, %v770_v26   ;;  %825 = vperm.xlu1 %1590, %v771_v27  }
  0x37   : > { %810 = vperm.xlu0 %1589, %v768_v28   ;;  %815 = vperm.xlu1 %1590, %v769_v29  }
  0x3b   : > { %800 = vperm.xlu0 %1589, %v766_v30   ;;  %805 = vperm.xlu1 %1590, %v767_v31  }
  0x3f   : > { %790 = vperm.xlu0 %1589, %v764_v32   ;;  %795 = vperm.xlu1 %1590, %v765_v33  }
  0x43   : > { %780 = vperm.xlu0 %1589, %v762_v34   ;;  %785 = vperm.xlu1 %1590, %v763_v35  }
  0x8a   : > { %v464_v39 = vpop.permute.xlu0 %463  ;;  %v454_v40 = vpop.permute.xlu1 %453 }
  0x8e   : > { %v469_v44 = vpop.permute.xlu0 %468  ;;  %v459_v45 = vpop.permute.xlu1 %458 }
  0x92   : > { %v614_v18 = vpop.permute.xlu1 %613  ;;  %v609_v20 = vpop.permute.xlu0 %608 }
  0x96   : > { %v604_v23 = vpop.permute.xlu1 %603  ;;  %v599_v25 = vpop.permute.xlu0 %598 }
  0x9a   : > { %v594_v31 = vpop.permute.xlu1 %593 }
  0xd8   : > { %v529_v36 = vpop.f32.mrf.mxu1 }
  0xd9   : > { %v530_v59 = vadd.f32 %v529_v36, %v454_v40  ;;  %v589_v36 = vpop.permute.xlu0 %588 }
  0xda   : > { %v531_v37 = vpop.f32.mrf.mxu1 }
  0xdb   : > { %v532_v52 = vadd.f32 %v531_v37, %v454_v40  ;;  %v548_v3 = vmax.f32 %v530_v59, 0.0 }
  0xdc   : > { %v533_v38 = vpop.f32.mrf.mxu1 }
  0xdd   : > { %v534_v54 = vadd.f32 %v533_v38, %v459_v45  ;;  %v549_v61 = vmax.f32 %v532_v52, 0.0 }
  0xde   : > { %v535_v41 = vpop.f32.mrf.mxu1 }
  0xdf   : > { %v536_v47 = vadd.f32 %v535_v41, %v459_v45  ;;  %v550_v63 = vmax.f32 %v534_v54, 0.0 }
  0xe0   : > { %v539_v42 = vpop.f32.mrf.mxu1 }
  0xe1   : > { %v540_v50 = vadd.f32 %v539_v42, %v464_v39  ;;  %v551_v56 = vmax.f32 %v536_v47, 0.0  ;;  %v556_v4 = vpack.c.bf16 %v550_v63, %v548_v3 }
  0xe2   : > { %v541_v43 = vpop.f32.mrf.mxu1 }
  0xe3   : > { %v542_v48 = vadd.f32 %v541_v43, %v464_v39  ;;  %v552_v60 = vmax.f32 %v540_v50, 0.0  ;;  %v557_v2 = vpack.c.bf16 %v551_v56, %v549_v61 }
  0xe4   : > { %v543_v46 = vpop.f32.mrf.mxu1 }
  0xe5   : > { %v544_v49 = vadd.f32 %v543_v46, %v469_v44  ;;  %v553_v57 = vmax.f32 %v542_v48, 0.0  ;;  %v584_v48 = vpop.permute.xlu1 %583 }
  0xe6   : > { %v545_v51 = vpop.f32.mrf.mxu1 }
  0xe7   : > { %v546_v53 = vadd.f32 %v545_v51, %v469_v44  ;;  %v554_v55 = vmax.f32 %v544_v49, 0.0 }
  0xe9   : > { %v555_v58 = vmax.f32 %v546_v53, 0.0  ;;  %v558_v1 = vpack.c.bf16 %v554_v55, %v552_v60  ;;  %v579_v55 = vpop.permute.xlu0 %578 }
  0xeb   : > { %v559_v62 = vpack.c.bf16 %v555_v58, %v553_v57 }
  0xed   : > { %661 = vmatprep.subr.bf16.mxu1 %v559_v62 }
  0xee   : > { %662 = vmatpush1.bf16.msra.mxu1 %v558_v1 }
  0xef   : > { %663 = vmatprep.subr.bf16.mxu1 %v557_v2 }
  0xf2   : > { %664 = vmatpush1.bf16.msra.mxu1 %v556_v4 }
  0xf5   : > { %1477 = vmatmul.mubr.msk.bf16.vlgmr.msra.gmra.mxu1 %vm636_vm2, %v1594_v5 }
  0xf6   : > { %691 = vmatprep.mubr.bf16.mxu1 %v1636_v0 }
  0xfd   : > { %1478 = vmatmul.mubr.msk.bf16.gmra.mxu1 %vm636_vm2, %v1595_v6 }
  0xfe   : > { %701 = vmatprep.mubr.bf16.mxu1 %v1636_v0 }
 0x105   : > { %1479 = vmatmul.mubr.msk.bf16.gmra.mxu1 %vm636_vm2, %v1596_v7 }
 0x106   : > { %711 = vmatprep.mubr.bf16.mxu1 %v1636_v0 }
 0x10d   : > { %1480 = vmatmul.mubr.msk.bf16.gmra.mxu1 %vm636_vm2, %v1597_v8 }
 0x1b5   : > { %v683_v9 = vpop.f32.mrf.mxu1 }
 0x1b6   : > { %v684_v2 = vadd.f32 %v683_v9, %v579_v55  ;;  %v1599_v9 = vld [vmem:[%s2059_s5 + $0x8] sm:$0xff]  }
 0x1b7   : > { %v685_v10 = vpop.f32.mrf.mxu1 }
 0x1b8   : > { %v686_v58 = vadd.f32 %v685_v10, %v579_v55  ;;  %v722_v8 = vmax.f32 %v684_v2, 0.0  ;;  %v1598_v10 = vld [vmem:[%s2059_s5] sm:$0xff]  }
 0x1b9   : > { %v687_v11 = vpop.f32.mrf.mxu1 }
 0x1ba   : > { %v688_v60 = vadd.f32 %v687_v11, %v584_v48  ;;  %v723_v4 = vmax.f32 %v686_v58, 0.0  ;;  %v1600_v11 = vld [vmem:[%s2059_s5 + $0x10] sm:$0xff]  }
 0x1bb   : > { %v689_v12 = vpop.f32.mrf.mxu1 }
 0x1bc   : > { %v690_v52 = vadd.f32 %v689_v12, %v584_v48  ;;  %v724_v5 = vmax.f32 %v688_v60, 0.0 }
 0x1bd   : > { %v693_v13 = vpop.f32.mrf.mxu1 }
 0x1be   : > { %v694_v56 = vadd.f32 %v693_v13, %v589_v36  ;;  %v725_v63 = vmax.f32 %v690_v52, 0.0  ;;  %v738_v12 = vpack.c.bf16 %v724_v5, %v722_v8  ;;  %v1601_v13 = vld [vmem:[%s2059_s5 + $0x18] sm:$0xff]  }
 0x1bf   : > { %v695_v14 = vpop.f32.mrf.mxu1 }
 0x1c0   : > { %v696_v45 = vadd.f32 %v695_v14, %v589_v36  ;;  %v726_v3 = vmax.f32 %v694_v56, 0.0  ;;  %v739_v7 = vpack.c.bf16 %v725_v63, %v723_v4  ;;  %v1602_v14 = vld [vmem:[%s2059_s5 + $0x20] sm:$0xff]  }
 0x1c1   : > { %v697_v15 = vpop.f32.mrf.mxu1 }
 0x1c2   : > { %v698_v49 = vadd.f32 %v697_v15, %v594_v31  ;;  %v727_v59 = vmax.f32 %v696_v45, 0.0  ;;  %v1603_v15 = vld [vmem:[%s2059_s5 + $0x28] sm:$0xff]  }
 0x1c3   : > { %v699_v16 = vpop.f32.mrf.mxu1 }
 0x1c4   : > { %v700_v39 = vadd.f32 %v699_v16, %v594_v31  ;;  %v728_v61 = vmax.f32 %v698_v49, 0.0  ;;  %v1604_v16 = vld [vmem:[%s2059_s5 + $0x30] sm:$0xff]  }
 0x1c5   : > { %v703_v17 = vpop.f32.mrf.mxu1 }
 0x1c6   : > { %v704_v43 = vadd.f32 %v703_v17, %v599_v25  ;;  %v729_v53 = vmax.f32 %v700_v39, 0.0  ;;  %v740_v6 = vpack.c.bf16 %v728_v61, %v726_v3  ;;  %v1605_v17 = vld [vmem:[%s2059_s5 + $0x38] sm:$0xff]  }
 0x1c7   : > { %v705_v19 = vpop.f32.mrf.mxu1 }
 0x1c8   : > { %v706_v34 = vadd.f32 %v705_v19, %v599_v25  ;;  %v730_v57 = vmax.f32 %v704_v43, 0.0  ;;  %v741_v1 = vpack.c.bf16 %v729_v53, %v727_v59  ;;  %v1876_v19 = vpop.permute.xlu1 %855 }
 0x1c9   : > { %v707_v21 = vpop.f32.mrf.mxu1 }
 0x1ca   : > { %v708_v37 = vadd.f32 %v707_v21, %v604_v23  ;;  %v731_v46 = vmax.f32 %v706_v34, 0.0 }
 0x1cb   : > { %v709_v22 = vpop.f32.mrf.mxu1 }
 0x1cc   : > { %v710_v28 = vadd.f32 %v709_v22, %v604_v23  ;;  %v732_v50 = vmax.f32 %v708_v37, 0.0  ;;  %v1880_v21 = vpop.permute.xlu1 %845  ;;  %v1637_v23 = vmov -inf  }
 0x1cd   : > { %v713_v24 = vpop.f32.mrf.mxu1  ;;  %435 = vst.msk [vmem:[#allocation2 + $0x70] sm:$0xff] %vm420_vm4, %v1637_v23  ;;  %421 = vst.msk [vmem:[#allocation2] sm:$0xff] %vm420_vm4, %v1637_v23 }
 0x1ce   : > { %v714_v32 = vadd.f32 %v713_v24, %v609_v20  ;;  %v733_v40 = vmax.f32 %v710_v28, 0.0  ;;  %v742_v62 = vpack.c.bf16 %v732_v50, %v730_v57  ;;  %422 = vst.msk [vmem:[#allocation2 + $0x8] sm:$0xff] %vm420_vm4, %v1637_v23  ;;  %423 = vst.msk [vmem:[#allocation2 + $0x10] sm:$0xff] %vm420_vm4, %v1637_v23 }
 0x1cf   : > { %v715_v26 = vpop.f32.mrf.mxu1  ;;  %424 = vst.msk [vmem:[#allocation2 + $0x18] sm:$0xff] %vm420_vm4, %v1637_v23  ;;  %425 = vst.msk [vmem:[#allocation2 + $0x20] sm:$0xff] %vm420_vm4, %v1637_v23 }
 0x1d0   : > { %v716_v29 = vadd.f32 %v715_v26, %v609_v20  ;;  %v734_v44 = vmax.f32 %v714_v32, 0.0  ;;  %v743_v54 = vpack.c.bf16 %v733_v40, %v731_v46  ;;  %426 = vst.msk [vmem:[#allocation2 + $0x28] sm:$0xff] %vm420_vm4, %v1637_v23  ;;  %427 = vst.msk [vmem:[#allocation2 + $0x30] sm:$0xff] %vm420_vm4, %v1637_v23 }
 0x1d1   : > { %v717_v27 = vpop.f32.mrf.mxu1  ;;  %428 = vst.msk [vmem:[#allocation2 + $0x38] sm:$0xff] %vm420_vm4, %v1637_v23  ;;  %429 = vst.msk [vmem:[#allocation2 + $0x40] sm:$0xff] %vm420_vm4, %v1637_v23 }
 0x1d2   : > { %v718_v30 = vadd.f32 %v717_v27, %v614_v18  ;;  %v735_v41 = vmax.f32 %v716_v29, 0.0  ;;  %430 = vst.msk [vmem:[#allocation2 + $0x48] sm:$0xff] %vm420_vm4, %v1637_v23  ;;  %431 = vst.msk [vmem:[#allocation2 + $0x50] sm:$0xff] %vm420_vm4, %v1637_v23 }
 0x1d3   : > { %v719_v33 = vpop.f32.mrf.mxu1  ;;  %432 = vst.msk [vmem:[#allocation2 + $0x58] sm:$0xff] %vm420_vm4, %v1637_v23  ;;  %433 = vst.msk [vmem:[#allocation2 + $0x60] sm:$0xff] %vm420_vm4, %v1637_v23 }
 0x1d4   : > { %v720_v35 = vadd.f32 %v719_v33, %v614_v18  ;;  %v736_v38 = vmax.f32 %v718_v30, 0.0  ;;  %v1874_v18 = vpop.permute.xlu0 %850  ;;  %434 = vst.msk [vmem:[#allocation2 + $0x68] sm:$0xff] %vm420_vm4, %v1637_v23  ;;  %436 = vst.msk [vmem:[#allocation2 + $0x78] sm:$0xff] %vm420_vm4, %v1637_v23 }
 0x1d6   : > { %v737_v42 = vmax.f32 %v720_v35, 0.0  ;;  %v744_v51 = vpack.c.bf16 %v736_v38, %v734_v44 }
 0x1d8   : > { %v745_v47 = vpack.c.bf16 %v737_v42, %v735_v41  ;;  %v1878_v20 = vpop.permute.xlu0 %840 }
 0x1da   : > { %931 = vmatprep.subr.bf16.mxu0 %v745_v47 }
 0x1db   : > { %932 = vmatpush1.bf16.msra.mxu0 %v744_v51 }
 0x1dc   : > { %933 = vmatprep.subr.bf16.mxu0 %v743_v54  ;;  %v1882_v22 = vpop.permute.xlu0 %830 }
 0x1df   : > { %934 = vmatpush1.bf16.msra.mxu0 %v742_v62 }
 0x1e0   : > { %935 = vmatprep.subr.bf16.mxu0 %v741_v1  ;;  %v1902_v24 = vpop.permute.xlu0 %820 }
 0x1e3   : > { %936 = vmatpush1.bf16.msra.mxu0 %v740_v6 }
 0x1e4   : > { %937 = vmatprep.subr.bf16.mxu0 %v739_v7  ;;  %v1906_v26 = vpop.permute.xlu0 %810 }
 0x1e7   : > { %938 = vmatpush1.bf16.msra.mxu0 %v738_v12 }
 0x1e8   : > { %v1910_v28 = vpop.permute.xlu0 %800 }
 0x1ea   : > { %1489 = vmatmul.mubr.msk.bf16.vlgmr.msra.gmra.mxu0 %vm898_vm3, %v1598_v10 }
 0x1eb   : > { %965 = vmatprep.mubr.bf16.mxu0 %v1636_v0 }
 0x1ec   : > { %v791_v30 = vpop.permute.xlu0 %790 }
 0x1f0   : > { %v781_v32 = vpop.permute.xlu0 %780 }
 0x1f2   : > { %1490 = vmatmul.mubr.msk.bf16.gmra.mxu0 %vm898_vm3, %v1599_v9 }
 0x1f3   : > { %975 = vmatprep.mubr.bf16.mxu0 %v1636_v0 }
 0x1fa   : > { %1491 = vmatmul.mubr.msk.bf16.gmra.mxu0 %vm898_vm3, %v1600_v11 }
 0x1fb   : > { %985 = vmatprep.mubr.bf16.mxu0 %v1636_v0 }
 0x202   : > { %1492 = vmatmul.mubr.msk.bf16.gmra.mxu0 %vm898_vm3, %v1601_v13 }
 0x203   : > { %995 = vmatprep.mubr.bf16.mxu0 %v1636_v0 }
 0x20a   : > { %1493 = vmatmul.mubr.msk.bf16.gmra.mxu0 %vm898_vm3, %v1602_v14 }
 0x20b   : > { %1005 = vmatprep.mubr.bf16.mxu0 %v1636_v0 }
 0x212   : > { %1494 = vmatmul.mubr.msk.bf16.gmra.mxu0 %vm898_vm3, %v1603_v15 }
 0x213   : > { %1015 = vmatprep.mubr.bf16.mxu0 %v1636_v0 }
 0x21a   : > { %1495 = vmatmul.mubr.msk.bf16.gmra.mxu0 %vm898_vm3, %v1604_v16 }
 0x21b   : > { %1025 = vmatprep.mubr.bf16.mxu0 %v1636_v0  ;;  %v1900_v0 = vpop.permute.xlu1 %835 }
 0x21f   : > { %v1904_v25 = vpop.permute.xlu1 %825 }
 0x222   : > { %1496 = vmatmul.mubr.msk.bf16.gmra.mxu0 %vm898_vm3, %v1605_v17 }
 0x223   : > { %v1908_v27 = vpop.permute.xlu1 %815 }
 0x227   : > { %v1912_v29 = vpop.permute.xlu1 %805 }
 0x22b   : > { %v796_v31 = vpop.permute.xlu1 %795 }
 0x22f   : > { %v786_v37 = vpop.permute.xlu1 %785 }
 0x2aa   : > { %v957_v33 = vpop.f32.mrf.mxu0 }
 0x2ab   : > { %v958_v34 = vadd.f32 %v957_v33, %v781_v32 }
 0x2ac   : > { %v959_v35 = vpop.f32.mrf.mxu0 }
 0x2ad   : > { %v960_v36 = vadd.f32 %v959_v35, %v781_v32  ;;  %v1036_v39 = vmax.f32 %v958_v34, 0.0 }
 0x2ae   : > { %v961_v38 = vpop.f32.mrf.mxu0 }
 0x2af   : > { %v1037_v40 = vmax.f32 %v960_v36, 0.0  ;;  %v962_v41 = vadd.f32 %v961_v38, %v786_v37 }
 0x2b0   : > { %v963_v42 = vpop.f32.mrf.mxu0 }
 0x2b1   : > { %v964_v43 = vadd.f32 %v963_v42, %v786_v37  ;;  %v1914_v44 = vmax.f32 %v1036_v39, %v1037_v40  ;;  %v1038_v46 = vmax.f32 %v962_v41, 0.0 }
 0x2b2   : > { %v967_v45 = vpop.f32.mrf.mxu0 }
 0x2b3   : > { %v1039_v47 = vmax.f32 %v964_v43, 0.0  ;;  %v968_v48 = vadd.f32 %v967_v45, %v791_v30 }
 0x2b4   : > { %v969_v49 = vpop.f32.mrf.mxu0 }
 0x2b5   : > { %v970_v50 = vadd.f32 %v969_v49, %v791_v30  ;;  %v1916_v51 = vmax.f32 %v1038_v46, %v1039_v47  ;;  %v1040_v53 = vmax.f32 %v968_v48, 0.0 }
 0x2b6   : > { %v971_v52 = vpop.f32.mrf.mxu0 }
 0x2b7   : > { %v1041_v54 = vmax.f32 %v970_v50, 0.0  ;;  %v972_v55 = vadd.f32 %v971_v52, %v796_v31 }
 0x2b8   : > { %v973_v56 = vpop.f32.mrf.mxu0 }
 0x2b9   : > { %v974_v57 = vadd.f32 %v973_v56, %v796_v31  ;;  %v1918_v58 = vmax.f32 %v1040_v53, %v1041_v54  ;;  %v1042_v60 = vmax.f32 %v972_v55, 0.0 }
 0x2ba   : > { %v1920_v59 = vpop.f32.mrf.mxu0 }
 0x2bb   : > { %v1043_v61 = vmax.f32 %v974_v57, 0.0 }
 0x2bc   : > { %v1922_v62 = vpop.f32.mrf.mxu0 }
 0x2bd   : > { %v1924_v63 = vmax.f32 %v1042_v60, %v1043_v61 }
 0x2be   : > { %v1926_v1 = vpop.f32.mrf.mxu0 }
 0x2c0   : > { %v1928_v2 = vpop.f32.mrf.mxu0 }
 0x2c2   : > { %v987_v3 = vpop.f32.mrf.mxu0 }
 0x2c4   : > { %v989_v4 = vpop.f32.mrf.mxu0 }
 0x2c6   : > { %v1930_v5 = vpop.f32.mrf.mxu0 }
 0x2c8   : > { %v993_v6 = vpop.f32.mrf.mxu0 }
 0x2ca   : > { %v997_v7 = vpop.f32.mrf.mxu0 }
 0x2cb   : > { %v998_v57 = vadd.f32 %v997_v7, %v1902_v24 }
 0x2cc   : > { %v999_v8 = vpop.f32.mrf.mxu0 }
 0x2cd   : > { %v1000_v50 = vadd.f32 %v999_v8, %v1902_v24 }
 0x2ce   : > { %v1001_v12 = vpop.f32.mrf.mxu0 }
 0x2cf   : > { %v1053_v61 = vmax.f32 %v1000_v50, 0.0 }
 0x2d0   : > { %v1003_v10 = vpop.f32.mrf.mxu0 }
 0x2d2   : > { %v1007_v9 = vpop.f32.mrf.mxu0 }
 0x2d3   : > { %v1008_v47 = vadd.f32 %v1007_v9, %v1882_v22  ;;  %v1004_v9 = vadd.f32 %v1003_v10, %v1904_v25 }
 0x2d4   : > { %v1009_v11 = vpop.f32.mrf.mxu0 }
 0x2d5   : > { %v1010_v40 = vadd.f32 %v1009_v11, %v1882_v22 }
 0x2d6   : > { %v1011_v13 = vpop.f32.mrf.mxu0 }
 0x2d7   : > { %v1057_v52 = vmax.f32 %v1010_v40, 0.0  ;;  %v1012_v60 = vadd.f32 %v1011_v13, %v1900_v0  ;;  %v1055_v13 = vmax.f32 %v1004_v9, 0.0 }
 0x2d8   : > { %v1013_v14 = vpop.f32.mrf.mxu0 }
 0x2d9   : > { %v1014_v53 = vadd.f32 %v1013_v14, %v1900_v0  ;;  %v988_v14 = vadd.f32 %v987_v3, %v1906_v26  ;;  %v1058_v24 = vmax.f32 %v1012_v60, 0.0  ;;  %v980_v0 = vadd.f32 %v1922_v62, %v1910_v28 }
 0x2da   : > { %v1017_v15 = vpop.f32.mrf.mxu0  ;;  %v984_v62 = vadd.f32 %v1928_v2, %v1912_v29 }
 0x2db   : > { %v1018_v36 = vadd.f32 %v1017_v15, %v1878_v20  ;;  %v1059_v8 = vmax.f32 %v1014_v53, 0.0  ;;  %v1045_v3 = vmax.f32 %v980_v0, 0.0  ;;  %v1074_v53 = vld [vmem:[#allocation2 + $0x30] sm:$0xff] }
 0x2dc   : > { %v1019_v16 = vpop.f32.mrf.mxu0  ;;  %v1070_v0 = vld [vmem:[#allocation2 + $0x10] sm:$0xff] }
 0x2dd   : > { %v1020_v33 = vadd.f32 %v1019_v16, %v1878_v20  ;;  %v1060_v48 = vmax.f32 %v1018_v36, 0.0  ;;  %v1052_v16 = vmax.f32 %v998_v57, 0.0 }
 0x2de   : > { %v1021_v17 = vpop.f32.mrf.mxu0 }
 0x2df   : > { %v1061_v42 = vmax.f32 %v1020_v33, 0.0  ;;  %v1108_v10 = vmax.f32 %v1052_v16, %v1053_v61  ;;  %v1072_v61 = vld [vmem:[#allocation2 + $0x20] sm:$0xff] }
 0x2e0   : > { %v1023_v23 = vpop.f32.mrf.mxu0 }
 0x2e1   : > { %v1024_v43 = vadd.f32 %v1023_v23, %v1880_v21  ;;  %v1120_v56 = vmax.f32 %v1060_v48, %v1061_v42  ;;  %v1117_v23 = vmax.f32 %v1058_v24, %v1059_v8  ;;  %v1081_v42 = vld [vmem:[#allocation2 + $0x68] sm:$0xff]  ;;  %v1076_v48 = vld [vmem:[#allocation2 + $0x40] sm:$0xff] }
 0x2e2   : > { %v1027_v30 = vpop.f32.mrf.mxu0  ;;  %v1073_v24 = vld [vmem:[#allocation2 + $0x28] sm:$0xff] }
 0x2e3   : > { %v1028_v31 = vadd.f32 %v1027_v30, %v1874_v18  ;;  %v1063_v54 = vmax.f32 %v1024_v43, 0.0  ;;  %v978_v30 = vadd.f32 %v1920_v59, %v1910_v28  ;;  %v1047_v28 = vmax.f32 %v984_v62, 0.0 }
 0x2e4   : > { %v1029_v32 = vpop.f32.mrf.mxu0 }
 0x2e5   : > { %v1030_v34 = vadd.f32 %v1029_v32, %v1874_v18  ;;  %v1064_v37 = vmax.f32 %v1028_v31, 0.0  ;;  %v1022_v18 = vadd.f32 %v1021_v17, %v1880_v21  ;;  %v990_v21 = vadd.f32 %v989_v4, %v1906_v26 }
 0x2e6   : > { %v1031_v35 = vpop.f32.mrf.mxu0  ;;  %v1002_v17 = vadd.f32 %v1001_v12, %v1904_v25  ;;  %v994_v4 = vadd.f32 %v993_v6, %v1908_v27  ;;  %v1048_v31 = vmax.f32 %v988_v14, 0.0  ;;  %v992_v26 = vadd.f32 %v1930_v5, %v1908_v27 }
 0x2e7   : > { %v1065_v38 = vmax.f32 %v1030_v34, 0.0  ;;  %v1032_v39 = vadd.f32 %v1031_v35, %v1876_v19  ;;  %v1062_v22 = vmax.f32 %v1022_v18, 0.0  ;;  %v1049_v7 = vmax.f32 %v990_v21, 0.0  ;;  %v1075_v21 = vld [vmem:[#allocation2 + $0x38] sm:$0xff] }
 0x2e8   : > { %v1033_v41 = vpop.f32.mrf.mxu0  ;;  %v1054_v25 = vmax.f32 %v1002_v17, 0.0  ;;  %v1051_v12 = vmax.f32 %v994_v4, 0.0  ;;  %v1044_v33 = vmax.f32 %v978_v30, 0.0  ;;  %v982_v34 = vadd.f32 %v1926_v1, %v1912_v29  ;;  %v1606_v29 = vld [vmem:[%s2061_s7] sm:$0xff]   ;;  %v1082_v1 = vld [vmem:[#allocation2 + $0x70] sm:$0xff] }
 0x2e9   : > { %v1034_v45 = vadd.f32 %v1033_v41, %v1876_v19  ;;  %v1126_v46 = vmax.f32 %v1064_v37, %v1065_v38  ;;  %v1066_v49 = vmax.f32 %v1032_v39, 0.0  ;;  %v1056_v19 = vmax.f32 %v1008_v47, 0.0  ;;  %1543 = vmatprep.mubr.bf16.mxu1 %v1606_v29  ;;  %v1083_v38 = vld [vmem:[#allocation2 + $0x78] sm:$0xff]  ;;  %v1080_v39 = vld [vmem:[#allocation2 + $0x60] sm:$0xff] }
 0x2ea   : > { %v1123_v11 = vmax.f32 %v1062_v22, %v1063_v54  ;;  %v1111_v32 = vmax.f32 %v1054_v25, %v1055_v13  ;;  %v1102_v6 = vmax.f32 %v1048_v31, %v1049_v7  ;;  %v1050_v35 = vmax.f32 %v992_v26, 0.0  ;;  %v1079_v47 = vld [vmem:[#allocation2 + $0x58] sm:$0xff]  ;;  %v1068_v25 = vld [vmem:[#allocation2] sm:$0xff] }
 0x2eb   : > { %v1067_v20 = vmax.f32 %v1034_v45, 0.0  ;;  %1127 = vmax.xlane.f32.xlu0 %v1126_v46  ;;  %v1114_v15 = vmax.f32 %v1056_v19, %v1057_v52  ;;  %v1096_v27 = vmax.f32 %v1044_v33, %v1045_v3  ;;  %v1046_v5 = vmax.f32 %v982_v34, 0.0  ;;  %v1077_v52 = vld [vmem:[#allocation2 + $0x48] sm:$0xff]  ;;  %v1071_v26 = vld [vmem:[#allocation2 + $0x18] sm:$0xff] }
 0x2ec   : > { %v1105_v59 = vmax.f32 %v1050_v35, %v1051_v12  ;;  %v1069_v35 = vld [vmem:[#allocation2 + $0x8] sm:$0xff] }
 0x2ed   : > { %v1129_v55 = vmax.f32 %v1066_v49, %v1067_v20  ;;  %v1099_v36 = vmax.f32 %v1046_v5, %v1047_v28 }
 0x2ef   : > { %1130 = vmax.xlane.f32.xlu1 %v1129_v55  ;;  %1121 = vmax.xlane.f32.xlu0 %v1120_v56 }
 0x2f3   : > { %1124 = vmax.xlane.f32.xlu0 %v1123_v11  ;;  %1115 = vmax.xlane.f32.xlu1 %v1114_v15 }
 0x2f7   : > { %1118 = vmax.xlane.f32.xlu0 %v1117_v23  ;;  %1109 = vmax.xlane.f32.xlu1 %v1108_v10 }
 0x2fb   : > { %1112 = vmax.xlane.f32.xlu0 %v1111_v32  ;;  %1103 = vmax.xlane.f32.xlu1 %v1102_v6 }
 0x2ff   : > { %1106 = vmax.xlane.f32.xlu0 %v1105_v59  ;;  %1097 = vmax.xlane.f32.xlu1 %v1096_v27 }
 0x303   : > { %1100 = vmax.xlane.f32.xlu0 %v1099_v36  ;;  %1091 = vmax.xlane.f32.xlu1 %v1918_v58 }
 0x307   : > { %1094 = vmax.xlane.f32.xlu0 %v1924_v63  ;;  %1085 = vmax.xlane.f32.xlu1 %v1914_v44  ;;  %v1078_v44 = vld [vmem:[#allocation2 + $0x50] sm:$0xff] }
 0x30b   : > { %1088 = vmax.xlane.f32.xlu0 %v1916_v51 }
 0x374   : > { %v1128_v2 = vpop.xlane.xlu0 %1127 }
 0x375   : > { %v1146_v37 = vmax.f32 %v1082_v1, %v1128_v2 }
 0x377   : > { %1163 = vst.msk [vmem:[#allocation2 + $0x70] sm:$0xff] %vm420_vm4, %v1146_v37 }
 0x378   : > { %v1131_v40 = vpop.xlane.xlu1 %1130  ;;  %v1122_v58 = vpop.xlane.xlu0 %1121 }
 0x379   : > { %v1147_v41 = vmax.f32 %v1083_v38, %v1131_v40  ;;  %v1144_v63 = vmax.f32 %v1080_v39, %v1122_v58 }
 0x37b   : > { %1164 = vst.msk [vmem:[#allocation2 + $0x78] sm:$0xff] %vm420_vm4, %v1147_v41  ;;  %1161 = vst.msk [vmem:[#allocation2 + $0x60] sm:$0xff] %vm420_vm4, %v1144_v63  ;;  %v1607_v63 = vld [vmem:[%s2061_s7 + $0x8] sm:$0xff]  }
 0x37c   : > { %v1125_v51 = vpop.xlane.xlu0 %1124  ;;  %v1116_v43 = vpop.xlane.xlu1 %1115 }
 0x37d   : > { %v1145_v45 = vmax.f32 %v1081_v42, %v1125_v51  ;;  %v1142_v46 = vmax.f32 %v1078_v44, %v1116_v43  ;;  %v1608_v42 = vld [vmem:[%s2061_s7 + $0x10] sm:$0xff]   ;;  %v1609_v44 = vld [vmem:[%s2061_s7 + $0x18] sm:$0xff]   ;;  %v1610_v51 = vld [vmem:[%s2063_s9] sm:$0xff]  }
 0x37e   : > { %v1182_v54 = vld [vmem:[#allocation2 + $0x70] sm:$0xff] }
 0x37f   : > { %1162 = vst.msk [vmem:[#allocation2 + $0x68] sm:$0xff] %vm420_vm4, %v1145_v45  ;;  %1159 = vst.msk [vmem:[#allocation2 + $0x50] sm:$0xff] %vm420_vm4, %v1142_v46 }
 0x380   : > { %v1119_v18 = vpop.xlane.xlu0 %1118  ;;  %v1110_v49 = vpop.xlane.xlu1 %1109 }
 0x381   : > { %v1143_v20 = vmax.f32 %v1079_v47, %v1119_v18  ;;  %v1140_v50 = vmax.f32 %v1076_v48, %v1110_v49  ;;  %v1206_v48 = vld [vmem:[%s2062_s8 + $0x30] sm:$0xff] }
 0x382   : > { %v1183_v55 = vld [vmem:[#allocation2 + $0x78] sm:$0xff]  ;;  %v1180_v9 = vld [vmem:[#allocation2 + $0x60] sm:$0xff] }
 0x383   : > { %1160 = vst.msk [vmem:[#allocation2 + $0x58] sm:$0xff] %vm420_vm4, %v1143_v20  ;;  %1157 = vst.msk [vmem:[#allocation2 + $0x40] sm:$0xff] %vm420_vm4, %v1140_v50  ;;  %v1191_v56 = vpack.c.bf16 %v1183_v55, %v1182_v54  ;;  %v1204_v20 = vld [vmem:[%s2062_s8 + $0x20] sm:$0xff]  ;;  %v1207_v50 = vld [vmem:[%s2062_s8 + $0x38] sm:$0xff] }
 0x384   : > { %v1113_v57 = vpop.xlane.xlu0 %1112  ;;  %v1104_v19 = vpop.xlane.xlu1 %1103  ;;  %v1205_v55 = vld [vmem:[%s2062_s8 + $0x28] sm:$0xff] }
 0x385   : > { %v1141_v60 = vmax.f32 %v1077_v52, %v1113_v57  ;;  %v1138_v22 = vmax.f32 %v1074_v53, %v1104_v19  ;;  %1527 = vmatprep.subr.bf16.mxu1 %v1191_v56  ;;  %v1203_v53 = vld [vmem:[%s2062_s8 + $0x18] sm:$0xff]  ;;  %v1202_v19 = vld [vmem:[%s2062_s8 + $0x10] sm:$0xff] }
 0x386   : > { %1528 = vmatpush3.bf16.msra.mxu1 %v1191_v56  ;;  %v1181_v8 = vld [vmem:[#allocation2 + $0x68] sm:$0xff]  ;;  %v1178_v7 = vld [vmem:[#allocation2 + $0x50] sm:$0xff] }
 0x387   : > { %1158 = vst.msk [vmem:[#allocation2 + $0x48] sm:$0xff] %vm420_vm4, %v1141_v60  ;;  %1155 = vst.msk [vmem:[#allocation2 + $0x30] sm:$0xff] %vm420_vm4, %v1138_v22  ;;  %v1190_v11 = vpack.c.bf16 %v1181_v8, %v1180_v9  ;;  %v1201_v8 = vld [vmem:[%s2062_s8 + $0x8] sm:$0xff] }
 0x388   : > { %v1107_v15 = vpop.xlane.xlu0 %1106  ;;  %v1098_v14 = vpop.xlane.xlu1 %1097 }
 0x389   : > { %v1139_v16 = vmax.f32 %v1075_v21, %v1107_v15  ;;  %v1136_v17 = vmax.f32 %v1072_v61, %v1098_v14  ;;  %1529 = vmatprep.subr.bf16.mxu1 %v1190_v11 }
 0x38a   : > { %1530 = vmatpush3.bf16.msra.mxu1 %v1190_v11  ;;  %v1179_v4 = vld [vmem:[#allocation2 + $0x58] sm:$0xff]  ;;  %v1176_v3 = vld [vmem:[#allocation2 + $0x40] sm:$0xff] }
 0x38b   : > { %1156 = vst.msk [vmem:[#allocation2 + $0x38] sm:$0xff] %vm420_vm4, %v1139_v16  ;;  %1153 = vst.msk [vmem:[#allocation2 + $0x20] sm:$0xff] %vm420_vm4, %v1136_v17  ;;  %v1189_v13 = vpack.c.bf16 %v1179_v4, %v1178_v7  ;;  %v1200_v17 = vld [vmem:[%s2062_s8] sm:$0xff] }
 0x38c   : > { %v1101_v23 = vpop.xlane.xlu0 %1100  ;;  %v1092_v10 = vpop.xlane.xlu1 %1091 }
 0x38d   : > { %v1137_v30 = vmax.f32 %v1073_v24, %v1101_v23  ;;  %v1134_v31 = vmax.f32 %v1070_v0, %v1092_v10  ;;  %1531 = vmatprep.subr.bf16.mxu1 %v1189_v13 }
 0x38e   : > { %1532 = vmatpush3.bf16.msra.mxu1 %v1189_v13  ;;  %v1177_v62 = vld [vmem:[#allocation2 + $0x48] sm:$0xff]  ;;  %v1174_v28 = vld [vmem:[#allocation2 + $0x30] sm:$0xff] }
 0x38f   : > { %1154 = vst.msk [vmem:[#allocation2 + $0x28] sm:$0xff] %vm420_vm4, %v1137_v30  ;;  %1151 = vst.msk [vmem:[#allocation2 + $0x10] sm:$0xff] %vm420_vm4, %v1134_v31  ;;  %v1188_v12 = vpack.c.bf16 %v1177_v62, %v1176_v3  ;;  %v1313_v62 = vld [vmem:[%s2064_s10] sm:$0xff] }
 0x390   : > { %v1095_v32 = vpop.xlane.xlu0 %1094  ;;  %v1086_v6 = vpop.xlane.xlu1 %1085 }
 0x391   : > { %v1135_v33 = vmax.f32 %v1071_v26, %v1095_v32  ;;  %v1132_v34 = vmax.f32 %v1068_v25, %v1086_v6  ;;  %1533 = vmatprep.subr.bf16.mxu1 %v1188_v12  ;;  %v1611_v26 = vld [vmem:[%s2063_s9 + $0x8] sm:$0xff]   ;;  %v1315_v25 = vld [vmem:[%s2064_s10 + $0x10] sm:$0xff]  ;;  %v1316_v6 = vld [vmem:[%s2064_s10 + $0x18] sm:$0xff] }
 0x392   : > { %1534 = vmatpush3.bf16.msra.mxu1 %v1188_v12  ;;  %v1175_v59 = vld [vmem:[#allocation2 + $0x38] sm:$0xff]  ;;  %v1172_v29 = vld [vmem:[#allocation2 + $0x20] sm:$0xff] }
 0x393   : > { %1152 = vst.msk [vmem:[#allocation2 + $0x18] sm:$0xff] %vm420_vm4, %v1135_v33  ;;  %1149 = vst.msk [vmem:[#allocation2] sm:$0xff] %vm420_vm4, %v1132_v34  ;;  %v1187_v27 = vpack.c.bf16 %v1175_v59, %v1174_v28  ;;  %v1314_v28 = vld [vmem:[%s2064_s10 + $0x8] sm:$0xff] }
 0x394   : > { %v1089_v5 = vpop.xlane.xlu0 %1088 }
 0x395   : > { %v1133_v36 = vmax.f32 %v1069_v35, %v1089_v5  ;;  %1535 = vmatprep.subr.bf16.mxu1 %v1187_v27 }
 0x396   : > { %1536 = vmatpush3.bf16.msra.mxu1 %v1187_v27  ;;  %v1173_v1 = vld [vmem:[#allocation2 + $0x28] sm:$0xff]  ;;  %v1170_v37 = vld [vmem:[#allocation2 + $0x10] sm:$0xff] }
 0x397   : > { %1150 = vst.msk [vmem:[#allocation2 + $0x8] sm:$0xff] %vm420_vm4, %v1133_v36  ;;  %v1186_v2 = vpack.c.bf16 %v1173_v1, %v1172_v29 }
 0x399   : > { %1537 = vmatprep.subr.bf16.mxu1 %v1186_v2 }
 0x39a   : > { %1538 = vmatpush3.bf16.msra.mxu1 %v1186_v2  ;;  %v1171_v38 = vld [vmem:[#allocation2 + $0x18] sm:$0xff]  ;;  %v1168_v40 = vld [vmem:[#allocation2] sm:$0xff] }
 0x39b   : > { %v1185_v39 = vpack.c.bf16 %v1171_v38, %v1170_v37 }
 0x39d   : > { %1539 = vmatprep.subr.bf16.mxu1 %v1185_v39 }
 0x39e   : > { %1540 = vmatpush3.bf16.msra.mxu1 %v1185_v39  ;;  %v1169_v58 = vld [vmem:[#allocation2 + $0x8] sm:$0xff] }
 0x39f   : > { %v1184_v41 = vpack.c.bf16 %v1169_v58, %v1168_v40 }
 0x3a1   : > { %1541 = vmatprep.subr.bf16.mxu1 %v1184_v41 }
 0x3a2   : > { %1542 = vmatpush3.bf16.msra.mxu1 %v1184_v41 }
 0x3a5   : > { %1544 = vmatmul.mubr.bf16.vlgmr.msra.gmra.mxu1 %v1607_v63 }
 0x3a6   : > { %1547 = vmatprep.mubr.bf16.mxu1 %v1608_v42 }
 0x3ad   : > { %1548 = vmatmul.mubr.bf16.gmra.mxu1 %v1609_v44 }
 0x3ae   : > { %1559 = vmatprep.mubr.msk.bf16.mxu1 %vm898_vm3, %v1610_v51 }
 0x465   : > { %v1545_v43 = vpop.f32.mrf.mxu1 }
 0x466   : > { %v1275_v11 = vadd.f32 %v1545_v43, %v1202_v19 }
 0x467   : > { %v1266_v45 = vpop.f32.mrf.mxu1 }
 0x468   : > { %v1299_v4 = vmax.f32 %v1275_v11, 0.0  ;;  %v1267_v13 = vadd.f32 %v1266_v45, %v1200_v17 }
 0x469   : > { %v1546_v46 = vpop.f32.mrf.mxu1 }
 0x46a   : > { %v1278_v22 = vadd.f32 %v1546_v46, %v1203_v53  ;;  %v1297_v30 = vmax.f32 %v1267_v13, 0.0 }
 0x46b   : > { %v1269_v47 = vpop.f32.mrf.mxu1 }
 0x46c   : > { %v1300_v24 = vmax.f32 %v1278_v22, 0.0  ;;  %v1270_v0 = vadd.f32 %v1269_v47, %v1201_v8 }
 0x46d   : > { %v1549_v18 = vpop.f32.mrf.mxu1 }
 0x46e   : > { %v1291_v52 = vadd.f32 %v1549_v18, %v1206_v48  ;;  %v1306_v23 = vpack.c.bf16 %v1300_v24, %v1299_v4  ;;  %v1298_v10 = vmax.f32 %v1270_v0, 0.0 }
 0x46f   : > { %v1282_v49 = vpop.f32.mrf.mxu1 }
 0x470   : > { %v1283_v56 = vadd.f32 %v1282_v49, %v1204_v20  ;;  %v1303_v21 = vmax.f32 %v1291_v52, 0.0  ;;  %v1305_v31 = vpack.c.bf16 %v1298_v10, %v1297_v30 }
 0x471   : > { %v1550_v54 = vpop.f32.mrf.mxu1 }
 0x472   : > { %v1294_v57 = vadd.f32 %v1550_v54, %v1207_v50  ;;  %v1301_v15 = vmax.f32 %v1283_v56, 0.0 }
 0x473   : > { %v1285_v60 = vpop.f32.mrf.mxu1 }
 0x474   : > { %v1304_v61 = vmax.f32 %v1294_v57, 0.0  ;;  %v1286_v9 = vadd.f32 %v1285_v60, %v1205_v55 }
 0x476   : > { %v1308_v14 = vpack.c.bf16 %v1304_v61, %v1303_v21  ;;  %v1302_v16 = vmax.f32 %v1286_v9, 0.0 }
 0x478   : > { %v1307_v7 = vpack.c.bf16 %v1302_v16, %v1301_v15  ;;  %1551 = vmatprep.subr.bf16.mxu1 %v1308_v14 }
 0x479   : > { %1552 = vmatpush3.bf16.msra.mxu1 %v1308_v14 }
 0x47a   : > { %1553 = vmatprep.subr.bf16.mxu1 %v1307_v7 }
 0x47d   : > { %1554 = vmatpush3.bf16.msra.mxu1 %v1307_v7 }
 0x47e   : > { %1555 = vmatprep.subr.bf16.mxu1 %v1306_v23 }
 0x481   : > { %1556 = vmatpush3.bf16.msra.mxu1 %v1306_v23 }
 0x482   : > { %1557 = vmatprep.subr.bf16.mxu1 %v1305_v31 }
 0x485   : > { %1558 = vmatpush3.bf16.msra.mxu1 %v1305_v31 }
 0x488   : > { %1560 = vmatmul.mubr.msk.bf16.vlgmr.msra.gmra.mxu1 %vm898_vm3, %v1611_v26 }
 0x548   : > { %v1561_v3 = vpop.f32.mrf.mxu1 }
 0x549   : > { %v1376_v12 = vadd.f32 %v1561_v3, %v1315_v25 }
 0x54a   : > { %v1367_v32 = vpop.f32.mrf.mxu1 }
 0x54b   : > { %v1384_v33 = vmax.f32 %v1376_v12, 0.0  ;;  %v1368_v34 = vadd.f32 %v1367_v32, %v1313_v62 }
 0x54c   : > { %v1562_v35 = vpop.f32.mrf.mxu1 }
 0x54d   : > { %1388 = vst.msk [vmem:[%s414_s24 + $0x10] sm:$0xff] %vm420_vm4, %v1384_v33  ;;  %v1382_v59 = vmax.f32 %v1368_v34, 0.0  ;;  %v1379_v27 = vadd.f32 %v1562_v35, %v1316_v6 }
 0x54e   : > { %v1370_v5 = vpop.f32.mrf.mxu1 }
 0x54f   : > { %1386 = vst.msk [vmem:[%s414_s24] sm:$0xff] %vm420_vm4, %v1382_v59  ;;  %v1385_v36 = vmax.f32 %v1379_v27, 0.0  ;;  %v1371_v29 = vadd.f32 %v1370_v5, %v1314_v28 }
 0x551   : > { %1389 = vst.msk [vmem:[%s414_s24 + $0x18] sm:$0xff] %vm420_vm4, %v1385_v36  ;;  %v1383_v1 = vmax.f32 %v1371_v29, 0.0 }
 0x553   : > { %1387 = vst.msk [vmem:[%s414_s24 + $0x8] sm:$0xff] %vm420_vm4, %v1383_v1 }
 0x554 PF: > { %s21_s19 = sadd.s32 1, %s1634_s19   ;;  %s2066_s17 = smov %s1630_s18 }
 0x555   : > { %p18_p5 = scmp.ge.s32.totalorder %s21_s19, 4   ;;  %s2067_s18 = smov %s2069_s20 }
 0x557   :  { %20 = sbr.rel (!%p18_p5) target bundleno = 2 (0x2), region = 102 }

</bundles_post_ra>
